<compile_context>
chip_gen: v7x
topology: tpu7x:2x2x1
jax: 0.10.0
libtpu: 0.0.40
codegen_flags: <defaults>
</compile_context>

<pallas_src>
import jax
import jax.numpy as jnp
from jax.experimental import pallas as pl
from jax.experimental.pallas import tpu as pltpu


def _exp_kernel(x_ref, o_ref):
    # Elementwise exp on the full VMEM tile (transcendental goes to the EUP slot).
    o_ref[...] = jnp.exp(x_ref[...])


_LANE = 128
# ~2 MiB per tile: 4 double-buffered tiles fit comfortably in every generation's
# scoped-VMEM default (v5e 16 MiB, v6e 32 MiB, v7x 32 MiB) with headroom.
_TARGET_TILE_BYTES = 2 * 1024 * 1024
# Candidate lane-dense slab widths (all multiples of 128), widest first.
_SLAB_WIDTHS = (4096, 2048, 1024, 512, 256, 128)
_FALLBACK_WIDTH = 512


def _sublane(dtype):
    # Packed sublane count: f32 -> 8, bf16/f16 -> 16, int8/fp8 -> 32.
    return max(8, 32 // jnp.dtype(dtype).itemsize)


def act_exp(x):
    """Pallas TPU implementation of ACT_EXP.forward: y = exp(x)."""
    orig_shape = x.shape
    dtype = x.dtype
    n = x.size
    itemsize = jnp.dtype(dtype).itemsize
    sublane = _sublane(dtype)

    # Pick the widest lane-dense slab width that exactly divides the element
    # count so the common (aligned) case needs no wrapper pad / tail slice.
    width = None
    for w in _SLAB_WIDTHS:
        if n % w == 0:
            width = w
            break

    x_flat = x.reshape(-1)
    if width is None:
        # Ragged fallback: pad the tail up to a multiple of (sublane * width).
        width = _FALLBACK_WIDTH
        chunk = width * sublane
        padded = pl.cdiv(n, chunk) * chunk
        x_flat = jnp.pad(x_flat, (0, padded - n))
        total = padded
        needs_slice = True
    else:
        total = n
        needs_slice = False

    rows = total // width

    # ~2 MiB row-blocks, rounded to the packed sublane count; small inputs use a
    # single full-size block (block dim == array dim is always legal).
    max_block_rows = max(
        sublane, (_TARGET_TILE_BYTES // (width * itemsize)) // sublane * sublane
    )
    block_rows = rows if rows <= max_block_rows else max_block_rows
    grid = (pl.cdiv(rows, block_rows),)

    x2d = x_flat.reshape(rows, width)
    out2d = pl.pallas_call(
        _exp_kernel,
        out_shape=jax.ShapeDtypeStruct((rows, width), dtype),
        grid=grid,
        in_specs=[pl.BlockSpec((block_rows, width), lambda i: (i, 0))],
        out_specs=pl.BlockSpec((block_rows, width), lambda i: (i, 0)),
        compiler_params=pltpu.CompilerParams(
            dimension_semantics=("parallel",),
        ),
    )(x2d)

    if needs_slice:
        return out2d.reshape(-1)[:n].reshape(orig_shape)
    return out2d.reshape(orig_shape)


if __name__ == "__main__":
    key = jax.random.PRNGKey(0)

    # Primary test: small NCHW input consistent with the module's forward.
    x = jax.random.normal(key, (2, 4, 16, 16), dtype=jnp.float32)
    y = jax.block_until_ready(act_exp(x))
    y_ref = jnp.exp(x)
    assert y.shape == x.shape and y.dtype == x.dtype
    assert jnp.allclose(y, y_ref, rtol=1e-6, atol=1e-6)

    # Ragged shape: exercises the fallback pad + tail-slice path.
    k1, k2 = jax.random.split(key)
    x_ragged = jax.random.normal(k1, (3, 5, 7, 11), dtype=jnp.float32)
    y_ragged = jax.block_until_ready(act_exp(x_ragged))
    assert y_ragged.shape == x_ragged.shape
    assert jnp.allclose(y_ragged, jnp.exp(x_ragged), rtol=1e-6, atol=1e-6)

    # Shape whose row count does not divide the block: exercises the cdiv grid
    # with a partial (masked) boundary block.
    x_partial = jax.random.normal(k2, (2, 17, 128, 128), dtype=jnp.float32)
    y_partial = jax.block_until_ready(act_exp(x_partial))
    assert y_partial.shape == x_partial.shape
    assert jnp.allclose(y_partial, jnp.exp(x_partial), rtol=1e-6, atol=1e-6)

    print("KERNEL_OK")
</pallas_src>

<mosaic_0001>
module attributes {stable_mosaic.version = 11 : i64} {
  func.func @_exp_kernel(%arg0: i32, %arg1: memref<1x2048xf32, #tpu.memory_space<vmem>>, %arg2: memref<1x2048xf32, #tpu.memory_space<vmem>>) attributes {dimension_semantics = [#tpu.dimension_semantics<parallel>], iteration_bounds = array<i64: 1>, scalar_prefetch = 0 : i64, scratch_operands = 0 : i64, tpu.core_type = #tpu.core_type<tc>, window_params = [{transform_indices = @transform_0, window_bounds = array<i64: 1, 2048>}, {transform_indices = @transform_1, window_bounds = array<i64: 1, 2048>}]} {
    %c0 = arith.constant 0 : index
    %c0_0 = arith.constant 0 : index
    %0 = vector.load %arg1[%c0, %c0_0] : memref<1x2048xf32, #tpu.memory_space<vmem>>, vector<1x2048xf32>
    %1 = math.exp %0 : vector<1x2048xf32>
    %c0_1 = arith.constant 0 : index
    %c0_2 = arith.constant 0 : index
    %2 = vector.load %arg2[%c0_1, %c0_2] : memref<1x2048xf32, #tpu.memory_space<vmem>>, vector<1x2048xf32>
    tpu.vector_store %arg2[%c0_1, %c0_2], %1 {strides = array<i32>} : memref<1x2048xf32, #tpu.memory_space<vmem>>, vector<1x2048xf32>,
    return
  }
  func.func @transform_0(%arg0: i32) -> (i32, i32) {
    %c0_i32 = arith.constant 0 : i32
    %c0_i32_0 = arith.constant 0 : i32
    return %arg0, %c0_i32 : i32, i32
  }
  func.func @transform_1(%arg0: i32) -> (i32, i32) {
    %c0_i32 = arith.constant 0 : i32
    %c0_i32_0 = arith.constant 0 : i32
    return %arg0, %c0_i32 : i32, i32
  }
}

</mosaic_0001>

<bundles_post_ra>
// kernel: tpu_custom_call.1
= control target key start
LH: loop header
LB: loop body
LE: loop exit
PB: predicated region body
PF: predicated region fallthrough
CT: control target
= control target key end

     0   :  { %6 = vsyncpa [#allocation3], 0  ;;  %s134_s0 = inlined_call_operand.hbm [shape: f32[1,2048], index: 0, kind: input, shape index: {}]   ;;  %s135_s1 = inlined_call_operand.hbm [shape: f32[1,2048], index: 1, kind: output, shape index: {}]  }
   0x1   :  { %7 = vsyncpa [#allocation4], 0  ;;  %s98_s6 = smov [#allocation2]   ;;  %s50_s10 = scalar_lea.hbm %s134_s0, 256 }
   0x2   :  { %s14_s7 = sshll.u32 %s98_s6, 4  ;;  %p51_p0 = scmp.ne.s32.totalorder %s134_s0, %s50_s10  ;;  %s15_s7 = int_to_ptr.vmem [resolvable:$true] %s14_s7 }
   0x3   :  { %p54_p1 = scmp.lt.u32.totalorder %s50_s10, %s134_s0 }
   0x5   :  { %p56_p2 = pnand %p54_p1, %p51_p0 }
   0x7   :  { %59 = shalt.err (!%p56_p2)
}
   0x8   :  { %s60_s15 = scalar_lea.vmem %s15_s7, 256  ;;  %p65_p4 = scmp.lt.s32.totalorder %s15_s7, %s15_s7 }
   0x9   :  { %p61_p3 = scmp.ne.s32.totalorder %s15_s7, %s60_s15  ;;  %p66_p5 = scmp.lt.s32.totalorder %s60_s15, %s60_s15 }
   0xb   :  { %p67_p6 = por %p66_p5, %p65_p4 }
   0xd   :  { %p68_p7 = pnand %p67_p6, %p61_p3 }
   0xf   :  { %71 = shalt.err (!%p68_p7)
}
  0x10   :  { %17 = dma.hbm_to_vmem [thread:$0]  %s134_s0, 256, %s15_s7, [#allocation3]  }
  0x11   :  { %94 = dma.done.wait [#allocation3], 256  }
  0x12   :  { %95 = vsyncadd [#allocation3], 4294967040  ;;  %v21_v0 = vld [vmem:[#allocation2] sm:$0xff]  ;;  %v22_v1 = vld [vmem:[#allocation2 + $0x8] sm:$0xff]  ;;  %s99_s18 = smov [#allocation5]  }
  0x13   :  { %v23_v2 = vmul.f32 1.442695, %v21_v0  ;;  %v25_v3 = vmul.f32 1.442695, %v22_v1  ;;  %s35_s19 = sshll.u32 %s99_s18, 4  ;;  %s36_s19 = int_to_ptr.vmem [resolvable:$true] %s35_s19 }
  0x14   :  { %s72_s20 = scalar_lea.vmem %s36_s19, 256  ;;  %p77_p9 = scmp.lt.s32.totalorder %s36_s19, %s36_s19 }
  0x15   :  { %46 = vpow2.f32 %v23_v2  ;;  %p73_p8 = scmp.ne.s32.totalorder %s36_s19, %s72_s20  ;;  %p78_p10 = scmp.lt.s32.totalorder %s72_s20, %s72_s20 }
  0x16   :  { %48 = vpow2.f32 %v25_v3 }
  0x17   :  { %p79_p11 = por %p78_p10, %p77_p9 }
  0x19   :  { %p80_p12 = pnand %p79_p11, %p73_p8 }
  0x1f   :  { %v47_v4 = vpop.eup %46 }
  0x20   :  { %v49_v5 = vpop.eup %48  ;;  %27 = vst [vmem:[#allocation5] sm:$0xff] %v47_v4 }
  0x21   :  { %28 = vst [vmem:[#allocation5 + $0x8] sm:$0xff] %v49_v5 }
  0x22   :  { %83 = shalt.err (!%p80_p12)
}
  0x23   :  { %s84_s22 = scalar_lea.hbm %s135_s1, 256 }
  0x24   :  { %p85_p13 = scmp.ne.s32.totalorder %s135_s1, %s84_s22  ;;  %p88_p0 = scmp.lt.u32.totalorder %s84_s22, %s135_s1 }
  0x26   :  { %p90_p1 = pnand %p88_p0, %p85_p13 }
  0x28   :  { %93 = shalt.err (!%p90_p1)
}
  0x29   :  { %38 = dma.vmem_to_hbm [thread:$0]  %s36_s19, 256, %s135_s1, [#allocation4]  }
  0x2a   :  { %96 = dma.done.wait [#allocation4], 256  }
  0x2b   :  { %97 = vsyncadd [#allocation4], 4294967040 }
  0x2c   :  { %42 = vsyncpa [#allocation3], 1 }
  0x2d   :  { %43 = vsyncpa [#allocation4], 1 }

</bundles_post_ra>
